<compile_context>
chip_gen: v7x
topology: tpu7x:2x2x1
jax: 0.10.0
libtpu: 0.0.40
codegen_flags: <defaults>
</compile_context>

<pallas_src>
import jax
import jax.numpy as jnp
from jax.experimental import pallas as pl
from jax.experimental.pallas import tpu as pltpu


def attn_pool_fc_kernel(x_ref, mask_ref, w1t_ref, b1_ref, w2_ref, fcw_ref,
                        b2_ref, fcb_ref, out_ref):
    """Fused AttentionPooling + final fc head.

    x_ref    : [B, S, H]  last_hidden_state                      (VMEM)
    mask_ref : [B, S]     attention mask (float)                 (VMEM)
    w1t_ref  : [H, H]     att_fc1.weight pre-transposed [in,out] (VMEM)
    b1_ref   : [1, H]     att_fc1.bias                           (VMEM)
    w2_ref   : [1, H]     att_fc2.weight (row vector)            (VMEM)
    fcw_ref  : [1, H]     fc.weight (row vector)                 (VMEM)
    b2_ref   : [1, 1]     att_fc2.bias                           (SMEM scalar)
    fcb_ref  : [1, 1]     fc.bias                                (SMEM scalar)
    out_ref  : [B, 1]     logits
    """
    B, S, H = x_ref.shape

    x3 = x_ref[...]                      # [B, S, H]
    mask = mask_ref[...]                 # [B, S]
    w1t = w1t_ref[...]                   # [H, H]
    b1 = b1_ref[...]                     # [1, H]
    w2row = w2_ref[...]                  # [1, H]
    fcw_row = fcw_ref[...]               # [1, H]
    b2 = b2_ref[0, 0]                    # scalar (SMEM)
    fcb = fcb_ref[0, 0]                  # scalar (SMEM)

    # e = tanh(x @ W1^T + b1) as one 2D MXU matmul on the flattened [B*S, H] slab.
    x2d = x3.reshape(B * S, H)
    e2d = jnp.tanh(
        jnp.dot(x2d, w1t, preferred_element_type=jnp.float32) + b1
    )                                    # [B*S, H]
    e3 = e2d.reshape(B, S, H)

    # alpha pre-activation: VPU multiply + last-axis reduce (no N=1 matvec).
    # NOTE: exp without max-subtraction to match the PyTorch reference exactly.
    s_pre = jnp.sum(e3 * w2row, axis=-1) + b2          # [B, S]
    alpha = jnp.exp(s_pre) * mask                      # [B, S]
    alpha = alpha / (jnp.sum(alpha, axis=-1, keepdims=True) + 1e-8)

    # Fused pooling + fc:  logits_b = sum_s alpha[b,s] * (x[b,s,:] . fc_w) + fc_b
    proj = jnp.sum(x3 * fcw_row, axis=-1)              # [B, S]
    logits = jnp.sum(alpha * proj, axis=-1, keepdims=True) + fcb  # [B, 1]

    out_ref[...] = logits.astype(out_ref.dtype)


def custom_model_forward(last_hidden_state, attention_mask,
                         w1, b1, w2, b2, fc_w, fc_b):
    """Wrapper: layout/transpose glue in plain JAX, hot path in one Pallas call.

    Shapes are tiny (B=2, S=8, H=32), so the full problem is processed in a single
    ungridded kernel invocation with every operand resident in VMEM/SMEM.
    """
    B, S, H = last_hidden_state.shape

    x = last_hidden_state.astype(jnp.float32)                   # [B, S, H]
    mask = attention_mask.astype(jnp.float32).reshape(B, S)     # [B, S] lane-dense
    w1t = jnp.transpose(w1.astype(jnp.float32))                 # [in, out]
    b1r = b1.reshape(1, H).astype(jnp.float32)                  # [1, H]
    w2r = w2.reshape(1, H).astype(jnp.float32)                  # [1, H]
    fcwr = fc_w.reshape(1, H).astype(jnp.float32)               # [1, H]
    b2s = b2.reshape(1, 1).astype(jnp.float32)                  # [1, 1] -> SMEM
    fcbs = fc_b.reshape(1, 1).astype(jnp.float32)               # [1, 1] -> SMEM

    vmem = pl.BlockSpec(memory_space=pltpu.MemorySpace.VMEM)
    smem = pl.BlockSpec(memory_space=pltpu.MemorySpace.SMEM)

    return pl.pallas_call(
        attn_pool_fc_kernel,
        out_shape=jax.ShapeDtypeStruct((B, 1), jnp.float32),
        in_specs=[vmem, vmem, vmem, vmem, vmem, vmem, smem, smem],
        out_specs=vmem,
    )(x, mask, w1t, b1r, w2r, fcwr, b2s, fcbs)


def reference_forward(x, mask, w1, b1, w2, b2, fc_w, fc_b):
    """Pure-JAX reference mirroring the PyTorch module."""
    e = jnp.tanh(jnp.einsum('bsh,dh->bsd', x, w1) + b1)
    alpha = jnp.exp(jnp.einsum('bsd,d->bs', e, w2) + b2)[..., None]
    alpha = alpha * mask[..., None]
    alpha = alpha / (jnp.sum(alpha, axis=1, keepdims=True) + 1e-8)
    pooled = jnp.einsum('bsh,bso->bh', x, alpha)
    return pooled @ fc_w[:, None] + fc_b


if __name__ == "__main__":
    # Small shapes consistent with the module's forward.
    B, S, H = 2, 8, 32
    init_std = 0.02  # plays the role of config.initializer_range

    key = jax.random.PRNGKey(0)
    k_x, k_w1, k_w2, k_fc = jax.random.split(key, 4)

    # "last_hidden_state" stand-in (backbone output) and attention mask.
    x = jax.random.normal(k_x, (B, S, H), dtype=jnp.float32)
    attention_mask = jnp.ones((B, S), dtype=jnp.float32)
    attention_mask = attention_mask.at[0, S - 2:].set(0.0)  # some padding on row 0

    # AttentionPooling params: normal(0, 0.02) weights, zero biases.
    w1 = 0.02 * jax.random.normal(k_w1, (H, H), dtype=jnp.float32)   # att_fc1.weight [out,in]
    b1 = jnp.zeros((H,), dtype=jnp.float32)                          # att_fc1.bias
    w2 = 0.02 * jax.random.normal(k_w2, (H,), dtype=jnp.float32)     # att_fc2.weight (flattened [1,H])
    b2 = jnp.zeros((1,), dtype=jnp.float32)                          # att_fc2.bias

    # fc head params: normal(0, initializer_range), zero bias.
    fc_w = init_std * jax.random.normal(k_fc, (H,), dtype=jnp.float32)  # fc.weight (flattened [1,H])
    fc_b = jnp.zeros((1,), dtype=jnp.float32)                           # fc.bias

    logits = custom_model_forward(x, attention_mask, w1, b1, w2, b2, fc_w, fc_b)
    logits = jax.block_until_ready(logits)

    ref = reference_forward(x, attention_mask, w1, b1, w2, b2, fc_w, fc_b)
    assert logits.shape == (B, 1), logits.shape
    assert jnp.allclose(logits, ref, atol=1e-5, rtol=1e-5), (logits, ref)

    print("KERNEL_OK")
</pallas_src>

<mosaic_0001>
module attributes {stable_mosaic.version = 11 : i64} {
  func.func @attn_pool_fc_kernel(%arg0: memref<2x8x32xf32, #tpu.memory_space<vmem>>, %arg1: memref<2x8xf32, #tpu.memory_space<vmem>>, %arg2: memref<32x32xf32, #tpu.memory_space<vmem>>, %arg3: memref<1x32xf32, #tpu.memory_space<vmem>>, %arg4: memref<1x32xf32, #tpu.memory_space<vmem>>, %arg5: memref<1x32xf32, #tpu.memory_space<vmem>>, %arg6: memref<1x1xf32, #tpu.memory_space<smem>>, %arg7: memref<1x1xf32, #tpu.memory_space<smem>>, %arg8: memref<2x1xf32, #tpu.memory_space<vmem>>) attributes {dimension_semantics = [], scalar_prefetch = 0 : i64, scratch_operands = 0 : i64, tpu.core_type = #tpu.core_type<tc>} {
    %c0 = arith.constant 0 : index
    %c0_0 = arith.constant 0 : index
    %c0_1 = arith.constant 0 : index
    %0 = vector.load %arg0[%c0, %c0_0, %c0_1] : memref<2x8x32xf32, #tpu.memory_space<vmem>>, vector<2x8x32xf32>
    %c0_2 = arith.constant 0 : index
    %c0_3 = arith.constant 0 : index
    %1 = vector.load %arg1[%c0_2, %c0_3] : memref<2x8xf32, #tpu.memory_space<vmem>>, vector<2x8xf32>
    %c0_4 = arith.constant 0 : index
    %c0_5 = arith.constant 0 : index
    %2 = vector.load %arg2[%c0_4, %c0_5] : memref<32x32xf32, #tpu.memory_space<vmem>>, vector<32x32xf32>
    %c0_6 = arith.constant 0 : index
    %c0_7 = arith.constant 0 : index
    %3 = vector.load %arg3[%c0_6, %c0_7] : memref<1x32xf32, #tpu.memory_space<vmem>>, vector<1x32xf32>
    %c0_8 = arith.constant 0 : index
    %c0_9 = arith.constant 0 : index
    %4 = vector.load %arg4[%c0_8, %c0_9] : memref<1x32xf32, #tpu.memory_space<vmem>>, vector<1x32xf32>
    %c0_10 = arith.constant 0 : index
    %c0_11 = arith.constant 0 : index
    %5 = vector.load %arg5[%c0_10, %c0_11] : memref<1x32xf32, #tpu.memory_space<vmem>>, vector<1x32xf32>
    %c0_12 = arith.constant 0 : index
    %c0_13 = arith.constant 0 : index
    %6 = memref.load %arg6[%c0_12, %c0_13] : memref<1x1xf32, #tpu.memory_space<smem>>
    %c0_14 = arith.constant 0 : index
    %c0_15 = arith.constant 0 : index
    %7 = memref.load %arg7[%c0_14, %c0_15] : memref<1x1xf32, #tpu.memory_space<smem>>
    %8 = vector.shape_cast %0 : vector<2x8x32xf32> to vector<16x32xf32>
    %cst = arith.constant dense<0.000000e+00> : vector<16x32xf32>
    %9 = tpu.matmul %8, %2, %cst {dimension_numbers = #tpu.dot_dimension_numbers<[1], [0], [0], [1], [0, 0, 1, 1], [], []>} : vector<16x32xf32>, vector<32x32xf32>, vector<16x32xf32> -> vector<16x32xf32>
    %10 = vector.broadcast %3 : vector<1x32xf32> to vector<16x32xf32>
    %11 = arith.addf %9, %10 : vector<16x32xf32>
    %12 = math.tanh %11 : vector<16x32xf32>
    %13 = vector.shape_cast %12 : vector<16x32xf32> to vector<2x8x32xf32>
    %14 = vector.shape_cast %4 : vector<1x32xf32> to vector<1x1x32xf32>
    %15 = vector.broadcast %14 : vector<1x1x32xf32> to vector<2x8x32xf32>
    %16 = arith.mulf %13, %15 : vector<2x8x32xf32>
    %cst_16 = arith.constant dense<0.000000e+00> : vector<2x8xf32>
    %17 = vector.multi_reduction <add>, %16, %cst_16 [2] : vector<2x8x32xf32> to vector<2x8xf32>
    %18 = vector.broadcast %6 : f32 to vector<2x8xf32>
    %19 = arith.addf %17, %18 : vector<2x8xf32>
    %20 = math.exp %19 : vector<2x8xf32>
    %21 = arith.mulf %20, %1 : vector<2x8xf32>
    %cst_17 = arith.constant dense<0.000000e+00> : vector<2xf32>
    %22 = vector.multi_reduction <add>, %21, %cst_17 [1] : vector<2x8xf32> to vector<2xf32>
    %23 = vector.shape_cast %22 : vector<2xf32> to vector<2x1xf32>
    %cst_18 = arith.constant 9.99999993E-9 : f32
    %24 = vector.broadcast %cst_18 : f32 to vector<2x1xf32>
    %25 = arith.addf %23, %24 : vector<2x1xf32>
    %26 = vector.broadcast %25 : vector<2x1xf32> to vector<2x8xf32>
    %27 = arith.divf %21, %26 : vector<2x8xf32>
    %28 = vector.shape_cast %5 : vector<1x32xf32> to vector<1x1x32xf32>
    %29 = vector.broadcast %28 : vector<1x1x32xf32> to vector<2x8x32xf32>
    %30 = arith.mulf %0, %29 : vector<2x8x32xf32>
    %cst_19 = arith.constant dense<0.000000e+00> : vector<2x8xf32>
    %31 = vector.multi_reduction <add>, %30, %cst_19 [2] : vector<2x8x32xf32> to vector<2x8xf32>
    %32 = arith.mulf %27, %31 : vector<2x8xf32>
    %cst_20 = arith.constant dense<0.000000e+00> : vector<2xf32>
    %33 = vector.multi_reduction <add>, %32, %cst_20 [1] : vector<2x8xf32> to vector<2xf32>
    %34 = vector.shape_cast %33 : vector<2xf32> to vector<2x1xf32>
    %35 = vector.broadcast %7 : f32 to vector<2x1xf32>
    %36 = arith.addf %34, %35 : vector<2x1xf32>
    %c0_21 = arith.constant 0 : index
    %c0_22 = arith.constant 0 : index
    %37 = vector.load %arg8[%c0_21, %c0_22] : memref<2x1xf32, #tpu.memory_space<vmem>>, vector<2x1xf32>
    tpu.vector_store %arg8[%c0_21, %c0_22], %36 {strides = array<i32>} : memref<2x1xf32, #tpu.memory_space<vmem>>, vector<2x1xf32>,
    return
  }
}

</mosaic_0001>

<bundles_post_ra>
// kernel: tpu_custom_call.1
= control target key start
LH: loop header
LB: loop body
LE: loop exit
PB: predicated region body
PF: predicated region fallthrough
CT: control target
= control target key end

     0   :  { %15 = vsyncpa [#allocation5], 0  ;;  %s500_s0 = inlined_call_operand.hbm [shape: f32[2,8,32], index: 0, kind: input, shape index: {}]   ;;  %s501_s1 = inlined_call_operand.vmem [shape: f32[2,8], index: 1, kind: input, shape index: {}]   ;;  %s502_s2 = inlined_call_operand.hbm [shape: f32[32,32], index: 2, kind: input, shape index: {}]   ;;  %s503_s3 = inlined_call_operand.vmem [shape: f32[1,32], index: 3, kind: input, shape index: {}]   ;;  %s504_s4 = inlined_call_operand.vmem [shape: f32[1,32], index: 4, kind: input, shape index: {}]   ;;  %s505_s5 = inlined_call_operand.vmem [shape: f32[1,32], index: 5, kind: input, shape index: {}]   ;;  %s506_s6 = inlined_call_operand.<no memory space> [shape: f32[1,1], index: 6, kind: input, shape index: {}]   ;;  %s507_s7 = inlined_call_operand.<no memory space> [shape: f32[1,1], index: 7, kind: input, shape index: {}]   ;;  %s508_s8 = inlined_call_operand.vmem [shape: f32[2,1], index: 8, kind: output, shape index: {}]  }
   0x1   :  { %16 = vsyncpa [#allocation7], 0  ;;  %s386_s27 = smov [#allocation4]   ;;  %s338_s9 = scalar_lea.hbm %s500_s0, 256 }
   0x2   :  { %s22_s28 = sshll.u32 %s386_s27, 4  ;;  %p339_p0 = scmp.ne.s32.totalorder %s500_s0, %s338_s9  ;;  %s23_s28 = int_to_ptr.vmem [resolvable:$true] %s22_s28 }
   0x3   :  { %p342_p1 = scmp.lt.u32.totalorder %s338_s9, %s500_s0 }
   0x5   :  { %p344_p2 = pnand %p342_p1, %p339_p0 }
   0x7   :  { %347 = shalt.err (!%p344_p2)
}
   0x8   :  { %s348_s14 = scalar_lea.vmem %s23_s28, 256  ;;  %p353_p4 = scmp.lt.s32.totalorder %s23_s28, %s23_s28 }
   0x9   :  { %p349_p3 = scmp.ne.s32.totalorder %s23_s28, %s348_s14  ;;  %p354_p5 = scmp.lt.s32.totalorder %s348_s14, %s348_s14 }
   0xb   :  { %p355_p6 = por %p354_p5, %p353_p4 }
   0xd   :  { %p356_p7 = pnand %p355_p6, %p349_p3 }
   0xf   :  { %359 = shalt.err (!%p356_p7)
}
  0x10   :  { %s387_s15 = smov 128   ;;  %s388_s16 = smov 8  }
  0x11   :  { %28 = dma.hbm_to_vmem [thread:$0]  %s500_s0, 256, %s23_s28, [#allocation5], %s387_s15, %s387_s15, %s388_s16  }
  0x12   :  { %s389_s19 = smov [#allocation6]   ;;  %s360_s23 = scalar_lea.hbm %s502_s2, 512 }
  0x13   :  { %s36_s20 = sshll.u32 %s389_s19, 4  ;;  %p361_p8 = scmp.ne.s32.totalorder %s502_s2, %s360_s23  ;;  %s37_s20 = int_to_ptr.vmem [resolvable:$true] %s36_s20 }
  0x14   :  { %p364_p9 = scmp.lt.u32.totalorder %s360_s23, %s502_s2 }
  0x16   :  { %p366_p10 = pnand %p364_p9, %p361_p8 }
  0x18   :  { %369 = shalt.err (!%p366_p10)
}
  0x19   :  { %s370_s29 = scalar_lea.vmem %s37_s20, 512  ;;  %p375_p12 = scmp.lt.s32.totalorder %s37_s20, %s37_s20 }
  0x1a   :  { %p371_p11 = scmp.ne.s32.totalorder %s37_s20, %s370_s29  ;;  %p376_p13 = scmp.lt.s32.totalorder %s370_s29, %s370_s29 }
  0x1c   :  { %p377_p0 = por %p376_p13, %p375_p12 }
  0x1e   :  { %p378_p1 = pnand %p377_p0, %p371_p11 }
  0x20   :  { %381 = shalt.err (!%p378_p1)
}
  0x21   :  { %42 = dma.hbm_to_vmem [thread:$0]  %s502_s2, 512, %s37_s20, [#allocation7], %s387_s15, %s387_s15, %s388_s16  }
  0x22   :  { %382 = dma.done.wait [#allocation5], 256  }
  0x23   :  { %383 = vsyncadd [#allocation5], 4294967040 }
  0x24   :  { %384 = dma.done.wait [#allocation7], 512  }
  0x25   :  { %385 = vsyncadd [#allocation7], 4294966784  ;;  %vm77_vm0 = vcmask 261120   ;;  %v62_v0 = vld [vmem:[#allocation6] sm:$0xff]  ;;  %v63_v1 = vld [vmem:[#allocation6 + $0x8] sm:$0xff]  ;;  %v183_v8 = vlaneseq  ;;  %v390_v27 = vmov 0   ;;  %v175_v28 = vstv %s506_s6 }
  0x26   :  { %v64_v2 = vld [vmem:[#allocation6 + $0x10] sm:$0xff]  ;;  %v311_v3 = vpack.c.bf16 %v63_v1, %v62_v0  ;;  %v65_v4 = vld [vmem:[#allocation6 + $0x18] sm:$0xff]  ;;  %324 = vset.pattern.permute.xlu0 %v390_v27  ;;  %325 = vset.pattern.permute.xlu1 %v390_v27  ;;  %vm219_vm1 = vcmask 1041409   ;;  %vm222_vm2 = vcmask 58368   ;;  %vm281_vm3 = vcmask 1024  }
  0x27   :  { %v460_v5 = vld [vmem:[#allocation4] sm:$0xff]  ;;  %v315_v6 = vpack.c.bf16 %v65_v4, %v64_v2  ;;  %v60_v7 = vld [vmem:[#allocation4 + $0x8] sm:$0xff]  ;;  %v465_v9 = vshrl.u32 %v183_v8, 7  ;;  %v210_v44 = vand.u32 127, %v183_v8  ;;  %v279_v8 = vstv %s507_s7 }
  0x28   :  { %308 = vmatprep.mubr.msk.f32.mxu0 %vm77_vm0, %v460_v5  ;;  %312 = vmatprep.subr.bf16.mxu0 %v311_v3  ;;  %v61_v10 = vld [vmem:[%s501_s1] sm:$0x3] }
  0x29   :  { %314 = vmatpush3.bf16.msra.mxu0 %v311_v3  ;;  %v185_v11 = vsub.s32 0, %v465_v9  ;;  %v192_v12 = vsub.s32 1, %v465_v9  ;;  %v289_v15 = vld [vmem:[%s503_s3] ss:$0 sm:$0xff]  ;;  %v213_v45 = vsub.s32 %v210_v44, %v465_v9 }
  0x2a   :  { %316 = vmatprep.subr.bf16.mxu0 %v315_v6  ;;  %v292_v20 = vld [vmem:[%s504_s4] ss:$0 sm:$0xff] }
  0x2b   :  { %v186_v13 = vrot.slane %v61_v10, %v185_v11  ;;  %v193_v14 = vrot.slane %v61_v10, %v192_v12  ;;  %v293_v41 = vld [vmem:[%s505_s5] ss:$0 sm:$0xff] }
  0x2c   :  { %v249_v42 = vmul.f32 %v293_v41, %v60_v7  ;;  %v248_v50 = vmul.f32 %v293_v41, %v460_v5 }
  0x2d   :  { %318 = vmatpush3.bf16.msra.mxu0 %v315_v6  ;;  %188 = vbcast.lane.b32.xlu1 %v186_v13, 256 }
  0x2e   :  { %v253_v43 = vsel %vm77_vm0, %v249_v42, 0.0  ;;  %v250_v53 = vsel %vm77_vm0, %v248_v50, 0.0 }
  0x30   :  { %309 = vmatmul.mubr.msk.f32.vlgmr.msra.gmra.mrb[0].mxu0 %vm77_vm0, %v60_v7 }
  0x31   :  { %195 = vbcast.lane.b32.xlu1 %v193_v14, 256 }
  0x9f   :  { %v189_v35 = vpop.permute.xlu1 %188 }
  0xa3   :  { %v196_v38 = vpop.permute.xlu1 %195 }
 0x103   :  { %v310_v16 = vpop.f32.mrb[0].mxu0 }
 0x104   :  { %v156_v17 = vadd.f32 %v310_v16, %v289_v15  ;;  %v150_v18 = vpop.f32.mrb[1].mxu0 }
 0x105   :  { %v151_v19 = vadd.f32 %v289_v15, %v150_v18 }
 0x106   :  { %326 = vtanh.f32 %v156_v17 }
 0x107   :  { %328 = vtanh.f32 %v151_v19 }
 0x110   :  { %v327_v21 = vpop.eup %326 }
 0x111   :  { %v329_v22 = vpop.eup %328  ;;  %v168_v25 = vmul.f32 %v327_v21, %v292_v20 }
 0x112   :  { %v167_v23 = vmul.f32 %v329_v22, %v292_v20 }
 0x113   :  { %v172_v26 = vsel %vm77_vm0, %v168_v25, 0.0 }
 0x114   :  { %v169_v24 = vsel %vm77_vm0, %v167_v23, 0.0 }
 0x115   :  { %170 = vadd.xlane.f32.xlu0 %v169_v24 }
 0x119   :  { %173 = vadd.xlane.f32.xlu0 %v172_v26 }
 0x1a2   :  { %v171_v29 = vpop.xlane.xlu0 %170 }
 0x1a3   :  { %v176_v30 = vadd.f32 %v175_v28, %v171_v29 }
 0x1a5   :  { %v178_v31 = vmul.f32 1.442695, %v176_v30 }
 0x1a6   :  { %v174_v32 = vpop.xlane.xlu0 %173 }
 0x1a7   :  { %330 = vpow2.f32 %v178_v31  ;;  %v177_v33 = vadd.f32 %v175_v28, %v174_v32 }
 0x1a9   :  { %v180_v34 = vmul.f32 1.442695, %v177_v33 }
 0x1ab   :  { %332 = vpow2.f32 %v180_v34 }
 0x1b1   :  { %v331_v36 = vpop.eup %330 }
 0x1b2   :  { %v199_v37 = vmul.f32 %v331_v36, %v189_v35 }
 0x1b4   :  { %204 = vperm.xlu0 %324, %v199_v37  }
 0x1b5   :  { %v333_v39 = vpop.eup %332 }
 0x1b6   :  { %v200_v40 = vmul.f32 %v333_v39, %v196_v38 }
 0x1b8   :  { %207 = vperm.xlu1 %325, %v200_v40  }
 0x1d3   :  { %254 = vadd.xlane.f32.xlu0 %v253_v43 }
 0x233   :  { %v205_v46 = vpop.permute.xlu0 %204 }
 0x234   :  { %v214_v48 = vrot.slane %v205_v46, %v213_v45 }
 0x237   :  { %v208_v47 = vpop.permute.xlu1 %207 }
 0x238   :  { %v218_v49 = vrot.slane %v208_v47, %v213_v45 }
 0x23a   :  { %v220_v51 = vsel %vm219_vm1, %v218_v49, %v214_v48 }
 0x23b   :  { %v223_v52 = vsel %vm222_vm2, %v220_v51, 0.0 }
 0x23c   :  { %224 = vadd.xlane.f32.xlu1 %v223_v52 }
 0x240   :  { %251 = vadd.xlane.f32.xlu1 %v250_v53 }
 0x260   :  { %v255_v0 = vpop.xlane.xlu0 %254 }
 0x2c9   :  { %v225_v54 = vpop.xlane.xlu1 %224 }
 0x2ca   :  { %v226_v55 = vadd.f32 1e-08, %v225_v54 }
 0x2cc   :  { %v231_v56 = vrot.slane %v226_v55, %v185_v11  ;;  %v235_v57 = vrot.slane %v226_v55, %v192_v12 }
 0x2cd   :  { %v252_v59 = vpop.xlane.xlu1 %251 }
 0x2ce   :  { %334 = vrcp.f32 %v231_v56 }
 0x2cf   :  { %336 = vrcp.f32 %v235_v57 }
 0x2d8   :  { %v335_v58 = vpop.eup %334 }
 0x2d9   :  { %v337_v60 = vpop.eup %336  ;;  %v239_v61 = vmul.f32 %v335_v58, %v199_v37 }
 0x2da   :  { %v241_v63 = vmul.f32 %v337_v60, %v200_v40 }
 0x2db   :  { %v256_v62 = vmul.f32 %v252_v59, %v239_v61 }
 0x2dc   :  { %v257_v1 = vmul.f32 %v255_v0, %v241_v63 }
 0x2dd   :  { %261 = vperm.xlu1 %325, %v256_v62  }
 0x2e1   :  { %264 = vperm.xlu1 %325, %v257_v1  }
 0x35c   :  { %v262_v2 = vpop.permute.xlu1 %261 }
 0x35d   :  { %v269_v4 = vrot.slane %v262_v2, %v213_v45 }
 0x360   :  { %v265_v3 = vpop.permute.xlu1 %264 }
 0x361   :  { %v273_v5 = vrot.slane %v265_v3, %v213_v45 }
 0x363   :  { %v274_v6 = vsel %vm219_vm1, %v273_v5, %v269_v4 }
 0x364   :  { %v276_v7 = vsel %vm222_vm2, %v274_v6, 0.0 }
 0x365   :  { %277 = vadd.xlane.f32.xlu1 %v276_v7 }
 0x3f2   :  { %v278_v9 = vpop.xlane.xlu1 %277 }
 0x3f3   :  { %v280_v10 = vadd.f32 %v279_v8, %v278_v9 }
 0x3f5   :  { %282 = vst.msk [vmem:[%s508_s8] sm:$0x3] %vm281_vm3, %v280_v10 }
 0x3f6   :  { %287 = vsyncpa [#allocation5], 1 }
 0x3f7   :  { %288 = vsyncpa [#allocation7], 1 }

</bundles_post_ra>
